<compile_context>
chip_gen: v7x
topology: tpu7x:2x2x1
jax: 0.10.0
libtpu: 0.0.40
codegen_flags: <defaults>
</compile_context>

<pallas_src>
from functools import partial

import jax
import jax.numpy as jnp
from jax.experimental import pallas as pl
from jax.experimental.pallas import tpu as pltpu


def _triplet_kernel(x1_ref, x2_ref, x3_ref, w1_ref, b1_ref, w2_ref, b2_ref,
                    o_ref):
    # x*_ref: (N, D)        f32   (flattened branch inputs)
    # w1_ref: (D, H)        bf16
    # b1_ref: (1, H)        f32
    # w2_ref: (H, E_pad)    bf16  (zero-padded to lane-dense width 128)
    # b2_ref: (1, E_pad)    f32
    # o_ref:  (3, N, E_pad) f32   (one slab per branch)
    w1 = w1_ref[...]
    b1 = b1_ref[...]
    w2 = w2_ref[...]
    b2 = b2_ref[...]

    def embed(x_f32):
        xb = x_f32.astype(jnp.bfloat16)                       # VPU cast, tiny
        h = jnp.dot(xb, w1, preferred_element_type=jnp.float32)
        h = jnp.maximum(h + b1, 0.0)                          # f32 epilogue
        o = jnp.dot(h.astype(jnp.bfloat16), w2,
                    preferred_element_type=jnp.float32)
        return o + b2

    o_ref[0, :, :] = embed(x1_ref[...])
    o_ref[1, :, :] = embed(x2_ref[...])
    o_ref[2, :, :] = embed(x3_ref[...])


def prepare_params(params):
    """One-time weight prep: bf16 cast + lane-dense (128) output padding."""
    w1, b1, w2, b2 = params
    e = w2.shape[1]
    e_pad = ((e + 127) // 128) * 128
    w1_b = w1.astype(jnp.bfloat16)                                    # (D, H)
    w2_b = jnp.pad(w2, ((0, 0), (0, e_pad - e))).astype(jnp.bfloat16)  # (H, E_pad)
    b1_2d = b1.reshape(1, -1).astype(jnp.float32)                     # (1, H)
    b2_2d = jnp.pad(b2.reshape(1, -1),
                    ((0, 0), (0, e_pad - e))).astype(jnp.float32)     # (1, E_pad)
    return (w1_b, b1_2d, w2_b, b2_2d)


@partial(jax.jit, static_argnames=("embed_dim",))
def triplet_net_forward(x1, x2, x3, prepped, embed_dim):
    """Apply the shared embedding net to (x1, x2, x3); returns 3 embeddings."""
    w1_b, b1_2d, w2_b, b2_2d = prepped
    n = x1.shape[0]
    e_pad = w2_b.shape[1]

    # Flatten each branch row-major (== torch x.view(N, -1)); no concat/pad,
    # the reshapes fuse inside this jit.
    x1f = x1.reshape(n, -1)
    x2f = x2.reshape(n, -1)
    x3f = x3.reshape(n, -1)

    vmem_spec = pl.BlockSpec(memory_space=pltpu.MemorySpace.VMEM)

    out = pl.pallas_call(
        _triplet_kernel,
        out_shape=jax.ShapeDtypeStruct((3, n, e_pad), jnp.float32),
        in_specs=[vmem_spec] * 7,
        out_specs=vmem_spec,
    )(x1f, x2f, x3f, w1_b, b1_2d, w2_b, b2_2d)

    emb = out[:, :, :embed_dim]   # strip lane padding (fused inside jit)
    return emb[0], emb[1], emb[2]


def init_params(key, d, hidden, embed):
    k1, k2, k3, k4 = jax.random.split(key, 4)
    w1 = jax.random.normal(k1, (d, hidden), jnp.float32) * 0.02
    b1 = jax.random.normal(k2, (hidden,), jnp.float32) * 0.01
    w2 = jax.random.normal(k3, (hidden, embed), jnp.float32) * 0.02
    b2 = jax.random.normal(k4, (embed,), jnp.float32) * 0.01
    return w1, b1, w2, b2


if __name__ == "__main__":
    # Small shapes consistent with the module: NCHW images, batch=2,
    # channels=4, spatial=16x16 -> flattened D = 4*16*16 = 1024.
    N, C, H, W = 2, 4, 16, 16
    D = C * H * W
    HIDDEN = 128
    EMBED = 32

    key = jax.random.PRNGKey(0)
    kx1, kx2, kx3, kp = jax.random.split(key, 4)
    x1 = jax.random.normal(kx1, (N, C, H, W), jnp.float32)
    x2 = jax.random.normal(kx2, (N, C, H, W), jnp.float32)
    x3 = jax.random.normal(kx3, (N, C, H, W), jnp.float32)

    params = init_params(kp, D, HIDDEN, EMBED)
    prepped = prepare_params(params)          # one-time weight prep (hoisted)

    out1, out2, out3 = triplet_net_forward(x1, x2, x3, prepped, embed_dim=EMBED)
    jax.block_until_ready((out1, out2, out3))

    # Reference in plain f32 JAX (same math as the PyTorch forward).  The
    # kernel uses bf16 operands with f32 accumulation, so allow bf16-level
    # tolerance against the f32 reference.
    def ref_embed(x):
        w1, b1, w2, b2 = params
        h = jnp.maximum(x.reshape(N, -1) @ w1 + b1, 0.0)
        return h @ w2 + b2

    r1, r2, r3 = ref_embed(x1), ref_embed(x2), ref_embed(x3)
    assert out1.shape == (N, EMBED) and out2.shape == (N, EMBED) and out3.shape == (N, EMBED)
    assert jnp.allclose(out1, r1, atol=2e-2, rtol=2e-2)
    assert jnp.allclose(out2, r2, atol=2e-2, rtol=2e-2)
    assert jnp.allclose(out3, r3, atol=2e-2, rtol=2e-2)

    print("KERNEL_OK")
</pallas_src>

<mosaic_0001>
module attributes {stable_mosaic.version = 11 : i64} {
  func.func @_triplet_kernel(%arg0: memref<2x1024xf32, #tpu.memory_space<vmem>>, %arg1: memref<2x1024xf32, #tpu.memory_space<vmem>>, %arg2: memref<2x1024xf32, #tpu.memory_space<vmem>>, %arg3: memref<1024x128xbf16, #tpu.memory_space<vmem>>, %arg4: memref<1x128xf32, #tpu.memory_space<vmem>>, %arg5: memref<128x128xbf16, #tpu.memory_space<vmem>>, %arg6: memref<1x128xf32, #tpu.memory_space<vmem>>, %arg7: memref<3x2x128xf32, #tpu.memory_space<vmem>>) attributes {dimension_semantics = [], scalar_prefetch = 0 : i64, scratch_operands = 0 : i64, tpu.core_type = #tpu.core_type<tc>} {
    %c0 = arith.constant 0 : index
    %c0_0 = arith.constant 0 : index
    %0 = vector.load %arg3[%c0, %c0_0] : memref<1024x128xbf16, #tpu.memory_space<vmem>>, vector<1024x128xbf16>
    %c0_1 = arith.constant 0 : index
    %c0_2 = arith.constant 0 : index
    %1 = vector.load %arg4[%c0_1, %c0_2] : memref<1x128xf32, #tpu.memory_space<vmem>>, vector<1x128xf32>
    %c0_3 = arith.constant 0 : index
    %c0_4 = arith.constant 0 : index
    %2 = vector.load %arg5[%c0_3, %c0_4] : memref<128x128xbf16, #tpu.memory_space<vmem>>, vector<128x128xbf16>
    %c0_5 = arith.constant 0 : index
    %c0_6 = arith.constant 0 : index
    %3 = vector.load %arg6[%c0_5, %c0_6] : memref<1x128xf32, #tpu.memory_space<vmem>>, vector<1x128xf32>
    %c0_7 = arith.constant 0 : index
    %c0_8 = arith.constant 0 : index
    %4 = vector.load %arg0[%c0_7, %c0_8] : memref<2x1024xf32, #tpu.memory_space<vmem>>, vector<2x1024xf32>
    %5 = arith.truncf %4 : vector<2x1024xf32> to vector<2x1024xbf16>
    %cst = arith.constant dense<0.000000e+00> : vector<2x128xf32>
    %6 = tpu.matmul %5, %0, %cst {dimension_numbers = #tpu.dot_dimension_numbers<[1], [0], [0], [1], [0, 0, 1, 1], [], []>} : vector<2x1024xbf16>, vector<1024x128xbf16>, vector<2x128xf32> -> vector<2x128xf32>
    %7 = vector.broadcast %1 : vector<1x128xf32> to vector<2x128xf32>
    %8 = arith.addf %6, %7 : vector<2x128xf32>
    %cst_9 = arith.constant 0.000000e+00 : f32
    %9 = vector.broadcast %cst_9 : f32 to vector<2x128xf32>
    %10 = arith.maximumf %8, %9 : vector<2x128xf32>
    %11 = arith.truncf %10 : vector<2x128xf32> to vector<2x128xbf16>
    %cst_10 = arith.constant dense<0.000000e+00> : vector<2x128xf32>
    %12 = tpu.matmul %11, %2, %cst_10 {dimension_numbers = #tpu.dot_dimension_numbers<[1], [0], [0], [1], [0, 0, 1, 1], [], []>} : vector<2x128xbf16>, vector<128x128xbf16>, vector<2x128xf32> -> vector<2x128xf32>
    %13 = vector.broadcast %3 : vector<1x128xf32> to vector<2x128xf32>
    %14 = arith.addf %12, %13 : vector<2x128xf32>
    %c0_11 = arith.constant 0 : index
    %c0_12 = arith.constant 0 : index
    %c0_13 = arith.constant 0 : index
    %15 = vector.load %arg7[%c0_11, %c0_12, %c0_13] : memref<3x2x128xf32, #tpu.memory_space<vmem>>, vector<1x2x128xf32>
    %16 = vector.shape_cast %15 : vector<1x2x128xf32> to vector<2x128xf32>
    %17 = vector.shape_cast %14 : vector<2x128xf32> to vector<1x2x128xf32>
    tpu.vector_store %arg7[%c0_11, %c0_12, %c0_13], %17 {strides = array<i32>} : memref<3x2x128xf32, #tpu.memory_space<vmem>>, vector<1x2x128xf32>,
    %c0_14 = arith.constant 0 : index
    %c0_15 = arith.constant 0 : index
    %18 = vector.load %arg1[%c0_14, %c0_15] : memref<2x1024xf32, #tpu.memory_space<vmem>>, vector<2x1024xf32>
    %19 = arith.truncf %18 : vector<2x1024xf32> to vector<2x1024xbf16>
    %cst_16 = arith.constant dense<0.000000e+00> : vector<2x128xf32>
    %20 = tpu.matmul %19, %0, %cst_16 {dimension_numbers = #tpu.dot_dimension_numbers<[1], [0], [0], [1], [0, 0, 1, 1], [], []>} : vector<2x1024xbf16>, vector<1024x128xbf16>, vector<2x128xf32> -> vector<2x128xf32>
    %21 = vector.broadcast %1 : vector<1x128xf32> to vector<2x128xf32>
    %22 = arith.addf %20, %21 : vector<2x128xf32>
    %cst_17 = arith.constant 0.000000e+00 : f32
    %23 = vector.broadcast %cst_17 : f32 to vector<2x128xf32>
    %24 = arith.maximumf %22, %23 : vector<2x128xf32>
    %25 = arith.truncf %24 : vector<2x128xf32> to vector<2x128xbf16>
    %cst_18 = arith.constant dense<0.000000e+00> : vector<2x128xf32>
    %26 = tpu.matmul %25, %2, %cst_18 {dimension_numbers = #tpu.dot_dimension_numbers<[1], [0], [0], [1], [0, 0, 1, 1], [], []>} : vector<2x128xbf16>, vector<128x128xbf16>, vector<2x128xf32> -> vector<2x128xf32>
    %27 = vector.broadcast %3 : vector<1x128xf32> to vector<2x128xf32>
    %28 = arith.addf %26, %27 : vector<2x128xf32>
    %c1 = arith.constant 1 : index
    %c0_19 = arith.constant 0 : index
    %c0_20 = arith.constant 0 : index
    %29 = vector.load %arg7[%c1, %c0_19, %c0_20] : memref<3x2x128xf32, #tpu.memory_space<vmem>>, vector<1x2x128xf32>
    %30 = vector.shape_cast %29 : vector<1x2x128xf32> to vector<2x128xf32>
    %31 = vector.shape_cast %28 : vector<2x128xf32> to vector<1x2x128xf32>
    tpu.vector_store %arg7[%c1, %c0_19, %c0_20], %31 {strides = array<i32>} : memref<3x2x128xf32, #tpu.memory_space<vmem>>, vector<1x2x128xf32>,
    %c0_21 = arith.constant 0 : index
    %c0_22 = arith.constant 0 : index
    %32 = vector.load %arg2[%c0_21, %c0_22] : memref<2x1024xf32, #tpu.memory_space<vmem>>, vector<2x1024xf32>
    %33 = arith.truncf %32 : vector<2x1024xf32> to vector<2x1024xbf16>
    %cst_23 = arith.constant dense<0.000000e+00> : vector<2x128xf32>
    %34 = tpu.matmul %33, %0, %cst_23 {dimension_numbers = #tpu.dot_dimension_numbers<[1], [0], [0], [1], [0, 0, 1, 1], [], []>} : vector<2x1024xbf16>, vector<1024x128xbf16>, vector<2x128xf32> -> vector<2x128xf32>
    %35 = vector.broadcast %1 : vector<1x128xf32> to vector<2x128xf32>
    %36 = arith.addf %34, %35 : vector<2x128xf32>
    %cst_24 = arith.constant 0.000000e+00 : f32
    %37 = vector.broadcast %cst_24 : f32 to vector<2x128xf32>
    %38 = arith.maximumf %36, %37 : vector<2x128xf32>
    %39 = arith.truncf %38 : vector<2x128xf32> to vector<2x128xbf16>
    %cst_25 = arith.constant dense<0.000000e+00> : vector<2x128xf32>
    %40 = tpu.matmul %39, %2, %cst_25 {dimension_numbers = #tpu.dot_dimension_numbers<[1], [0], [0], [1], [0, 0, 1, 1], [], []>} : vector<2x128xbf16>, vector<128x128xbf16>, vector<2x128xf32> -> vector<2x128xf32>
    %41 = vector.broadcast %3 : vector<1x128xf32> to vector<2x128xf32>
    %42 = arith.addf %40, %41 : vector<2x128xf32>
    %c2 = arith.constant 2 : index
    %c0_26 = arith.constant 0 : index
    %c0_27 = arith.constant 0 : index
    %43 = vector.load %arg7[%c2, %c0_26, %c0_27] : memref<3x2x128xf32, #tpu.memory_space<vmem>>, vector<1x2x128xf32>
    %44 = vector.shape_cast %43 : vector<1x2x128xf32> to vector<2x128xf32>
    %45 = vector.shape_cast %42 : vector<2x128xf32> to vector<1x2x128xf32>
    tpu.vector_store %arg7[%c2, %c0_26, %c0_27], %45 {strides = array<i32>} : memref<3x2x128xf32, #tpu.memory_space<vmem>>, vector<1x2x128xf32>,
    return
  }
}

</mosaic_0001>

<bundles_post_ra>
// kernel: triplet_net_forward.1
= control target key start
LH: loop header
LB: loop body
LE: loop exit
PB: predicated region body
PF: predicated region fallthrough
CT: control target
= control target key end

     0   :  { %12 = vsyncpa [#allocation3], 0  ;;  %s1951_s24 = smov [#allocation2]   ;;  %s2499_s0 = inlined_call_operand.vmem [shape: f32[2,1024], index: 0, kind: input, shape index: {}]   ;;  %s2500_s1 = inlined_call_operand.vmem [shape: f32[2,1024], index: 1, kind: input, shape index: {}]   ;;  %s2501_s2 = inlined_call_operand.vmem [shape: f32[2,1024], index: 2, kind: input, shape index: {}]   ;;  %s2502_s3 = inlined_call_operand.hbm [shape: bf16[1024,128], index: 3, kind: input, shape index: {}]   ;;  %s2503_s4 = inlined_call_operand.vmem [shape: f32[1,128], index: 4, kind: input, shape index: {}]   ;;  %s2504_s5 = inlined_call_operand.vmem [shape: bf16[128,128], index: 5, kind: input, shape index: {}]   ;;  %s2505_s6 = inlined_call_operand.vmem [shape: f32[1,128], index: 6, kind: input, shape index: {}]   ;;  %s2506_s7 = inlined_call_operand.vmem [shape: f32[3,2,128], index: 7, kind: output, shape index: {}]  }
   0x1   :  { %s24_s25 = sshll.u32 %s1951_s24, 4  ;;  %s1927_s28 = scalar_lea.hbm %s2502_s3, 8192  ;;  %s25_s25 = int_to_ptr.vmem [resolvable:$true] %s24_s25 }
   0x2   :  { %p1928_p0 = scmp.ne.s32.totalorder %s2502_s3, %s1927_s28  ;;  %p1931_p1 = scmp.lt.u32.totalorder %s1927_s28, %s2502_s3 }
   0x4   :  { %p1933_p2 = pnand %p1931_p1, %p1928_p0 }
   0x6   :  { %1936 = shalt.err (!%p1933_p2)
}
   0x7   :  { %s1937_s10 = scalar_lea.vmem %s25_s25, 8192  ;;  %p1942_p4 = scmp.lt.s32.totalorder %s25_s25, %s25_s25 }
   0x8   :  { %p1938_p3 = scmp.ne.s32.totalorder %s25_s25, %s1937_s10  ;;  %p1943_p5 = scmp.lt.s32.totalorder %s1937_s10, %s1937_s10 }
   0xa   :  { %p1944_p6 = por %p1943_p5, %p1942_p4 }
   0xc   :  { %p1945_p7 = pnand %p1944_p6, %p1938_p3 }
   0xe   :  { %1948 = shalt.err (!%p1945_p7)
}
   0xf   :  { %s1952_s11 = smov 64   ;;  %s1953_s12 = smov 4  }
  0x10   :  { %30 = dma.hbm_to_vmem [thread:$0]  %s2502_s3, 8192, %s25_s25, [#allocation3], %s1952_s11, %s1952_s11, %s1953_s12  }
  0x11   :  { %1949 = dma.done.wait [#allocation3], 8192  }
  0x12   :  { %1950 = vsyncadd [#allocation3], 4294959104  ;;  %v2009_v0 = vld [vmem:[#allocation2 + $0x40] sm:$0xff]   ;;  %v2020_v4 = vld [vmem:[#allocation2 + $0x48] sm:$0xff]   ;;  %v1954_v22 = vmov 1983009808   ;;  %v195_v24 = vlaneseq }
  0x13   :  { %v2011_v1 = vld [vmem:[#allocation2 + $0xc0] sm:$0xff]   ;;  %1485 = vmatprep.subr.bf16.mxu0 %v2009_v0  ;;  %v2023_v5 = vld [vmem:[#allocation2 + $0xc8] sm:$0xff]   ;;  %v2032_v8 = vld [vmem:[#allocation2 + $0x50] sm:$0xff]   ;;  %v193_v23 = vunpack.c.l.s4 %v1954_v22  ;;  %vm1956_vm0 = vmmov 0  }
  0x14   :  { %v2014_v2 = vld [vmem:[#allocation2] sm:$0xff]   ;;  %1507 = vmatprep.subr.bf16.mxu1 %v2011_v1  ;;  %v2026_v6 = vld [vmem:[#allocation2 + $0x8] sm:$0xff]   ;;  %v2035_v9 = vld [vmem:[#allocation2 + $0xd0] sm:$0xff]   ;;  %v196_v30 = vshrl.u32 %v195_v24, 7 }
  0x15   :  { %v2017_v3 = vld [vmem:[#allocation2 + $0x80] sm:$0xff]   ;;  %1486 = vmatpush3.bf16.msra.mxu0 %v2014_v2  ;;  %v2029_v7 = vld [vmem:[#allocation2 + $0x88] sm:$0xff]   ;;  %v2038_v10 = vld [vmem:[#allocation2 + $0x10] sm:$0xff]   ;;  %v194_v29 = vunpack.c.0.s8 %v193_v23 }
  0x16   :  { %1508 = vmatpush3.bf16.msra.mxu1 %v2017_v3  ;;  %1487 = vmatprep.subr.bf16.mxu0 %v2020_v4  ;;  %v2041_v11 = vld [vmem:[#allocation2 + $0x90] sm:$0xff]   ;;  %v2044_v12 = vld [vmem:[#allocation2 + $0x58] sm:$0xff]   ;;  %v2056_v16 = vld [vmem:[#allocation2 + $0x60] sm:$0xff]  }
  0x17   :  { %1509 = vmatprep.subr.bf16.mxu1 %v2023_v5  ;;  %v2047_v13 = vld [vmem:[#allocation2 + $0xd8] sm:$0xff]   ;;  %v2059_v17 = vld [vmem:[#allocation2 + $0xe0] sm:$0xff]   ;;  %v2068_v20 = vld [vmem:[#allocation2 + $0x68] sm:$0xff]   ;;  %v2097_v35 = vsub.s32 %v194_v29, %v196_v30 }
  0x18   :  { %v2050_v14 = vld [vmem:[#allocation2 + $0x18] sm:$0xff]   ;;  %v2062_v18 = vld [vmem:[#allocation2 + $0x20] sm:$0xff]   ;;  %v2071_v21 = vld [vmem:[#allocation2 + $0xe8] sm:$0xff]  }
  0x19   :  { %1488 = vmatpush3.bf16.msra.mxu0 %v2026_v6  ;;  %v2053_v15 = vld [vmem:[#allocation2 + $0x98] sm:$0xff]   ;;  %v2065_v19 = vld [vmem:[#allocation2 + $0xa0] sm:$0xff]   ;;  %v2074_v25 = vld [vmem:[#allocation2 + $0x28] sm:$0xff]  }
  0x1a   :  { %1510 = vmatpush3.bf16.msra.mxu1 %v2029_v7  ;;  %1489 = vmatprep.subr.bf16.mxu0 %v2032_v8  ;;  %v2077_v26 = vld [vmem:[#allocation2 + $0xa8] sm:$0xff]   ;;  %v2080_v27 = vld [vmem:[#allocation2 + $0x70] sm:$0xff]   ;;  %v2092_v33 = vld [vmem:[#allocation2 + $0x78] sm:$0xff]  }
  0x1b   :  { %1511 = vmatprep.subr.bf16.mxu1 %v2035_v9  ;;  %v2083_v28 = vld [vmem:[#allocation2 + $0xf0] sm:$0xff]   ;;  %2553 = vst [vmem:[#allocation6_spill] sm:$0xff] %v2092_v33  ;;  %v2095_v34 = vld [vmem:[#allocation2 + $0xf8] sm:$0xff]   ;;  %v187_v38 = vld [vmem:[%s2499_s0] sm:$0xff] }
  0x1c   :  { %v2086_v31 = vld [vmem:[#allocation2 + $0x30] sm:$0xff]   ;;  %v2100_v36 = vld [vmem:[#allocation2 + $0x38] sm:$0xff]   ;;  %v198_v39 = vrot.slane %v187_v38, %v2097_v35  ;;  %v191_v40 = vcombine.high %v187_v38, %v187_v38  ;;  %v2111_v41 = vld [vmem:[#allocation2 + $0x140] sm:$0xff]  }
  0x1d   :  { %1490 = vmatpush3.bf16.msra.mxu0 %v2038_v10  ;;  %2552 = vst [vmem:[#allocation5_spill] sm:$0xff] %v2086_v31  ;;  %v2089_v32 = vld [vmem:[#allocation2 + $0xb0] sm:$0xff]   ;;  %2554 = vst [vmem:[#allocation7_spill] sm:$0xff] %v2100_v36  ;;  %v2103_v37 = vld [vmem:[#allocation2 + $0xb8] sm:$0xff]  }
  0x1e   :  { %1512 = vmatpush3.bf16.msra.mxu1 %v2041_v11  ;;  %1491 = vmatprep.subr.bf16.mxu0 %v2044_v12  ;;  %2555 = vst [vmem:[#allocation8_spill] sm:$0xff] %v2111_v41  ;;  %v2113_v42 = vld [vmem:[#allocation2 + $0x1c0] sm:$0xff]   ;;  %v206_v43 = vcombine.high %v198_v39, %v198_v39  ;;  %v205_v44 = vrot.slane %v191_v40, %v2097_v35  ;;  %v2122_v51 = vld [vmem:[#allocation2 + $0x148] sm:$0xff]   ;;  %v2132_v56 = vld [vmem:[#allocation2 + $0x150] sm:$0xff]  }
  0x1f   :  { %1513 = vmatprep.subr.bf16.mxu1 %v2047_v13  ;;  %v233_v45 = vpack.c.bf16 %v198_v39, %v198_v39  ;;  %v2118_v46 = vld [vmem:[#allocation2 + $0x100] sm:$0xff]   ;;  %v2124_v53 = vld [vmem:[#allocation2 + $0x1c8] sm:$0xff]   ;;  %v2135_v57 = vld [vmem:[#allocation2 + $0x1d0] sm:$0xff]  }
  0x20   :  { %v234_v47 = vpack.c.bf16 %v206_v43, %v206_v43  ;;  %v207_v48 = vcombine.high %v205_v44, %v205_v44  ;;  %v2120_v49 = vld [vmem:[#allocation2 + $0x180] sm:$0xff]   ;;  %v235_v50 = vpack.c.bf16 %v205_v44, %v205_v44  ;;  %2556 = vst [vmem:[#allocation9_spill] sm:$0xff] %v2124_v53  ;;  %v2126_v54 = vld [vmem:[#allocation2 + $0x108] sm:$0xff]   ;;  %2558 = vst [vmem:[#allocation11_spill] sm:$0xff] %v2135_v57 }
  0x21   :  { %1492 = vmatpush3.bf16.msra.mxu0 %v2050_v14  ;;  %v2129_v55 = vld [vmem:[#allocation2 + $0x188] sm:$0xff]   ;;  %v2138_v58 = vld [vmem:[#allocation2 + $0x110] sm:$0xff]   ;;  %v2144_v60 = vld [vmem:[#allocation2 + $0x158] sm:$0xff]  }
  0x22   :  { %1514 = vmatpush3.bf16.msra.mxu1 %v2053_v15  ;;  %1493 = vmatprep.subr.bf16.mxu0 %v2056_v16  ;;  %v236_v52 = vpack.c.bf16 %v207_v48, %v207_v48  ;;  %2557 = vst [vmem:[#allocation10_spill] sm:$0xff] %v2129_v55  ;;  %v2141_v59 = vld [vmem:[#allocation2 + $0x190] sm:$0xff]   ;;  %v2147_v61 = vld [vmem:[#allocation2 + $0x1d8] sm:$0xff]   ;;  %v2156_v22 = vld [vmem:[#allocation2 + $0x160] sm:$0xff]  }
  0x23   :  { %1515 = vmatprep.subr.bf16.mxu1 %v2059_v17  ;;  %663 = vmatprep.mubr.bf16.mxu0 %v234_v47  ;;  %2559 = vst [vmem:[#allocation12_spill] sm:$0xff] %v2141_v59  ;;  %2560 = vst [vmem:[#allocation13_spill] sm:$0xff] %v2147_v61  ;;  %v2150_v62 = vld [vmem:[#allocation2 + $0x118] sm:$0xff]   ;;  %v2159_v23 = vld [vmem:[#allocation2 + $0x1e0] sm:$0xff]  }
  0x24   :  { %703 = vmatprep.mubr.bf16.mxu1 %v236_v52  ;;  %v2153_v63 = vld [vmem:[#allocation2 + $0x198] sm:$0xff]   ;;  %2562 = vst [vmem:[#allocation15_spill] sm:$0xff] %v2156_v22  ;;  %2563 = vst [vmem:[#allocation16_spill] sm:$0xff] %v2159_v23  ;;  %v2162_v24 = vld [vmem:[#allocation2 + $0x120] sm:$0xff]  }
  0x25   :  { %1494 = vmatpush3.bf16.msra.mxu0 %v2062_v18  ;;  %2561 = vst [vmem:[#allocation14_spill] sm:$0xff] %v2153_v63  ;;  %2564 = vst [vmem:[#allocation17_spill] sm:$0xff] %v2162_v24  ;;  %v2165_v29 = vld [vmem:[#allocation2 + $0x1a0] sm:$0xff]   ;;  %v2168_v30 = vld [vmem:[#allocation2 + $0x168] sm:$0xff]  }
  0x26   :  { %1516 = vmatpush3.bf16.msra.mxu1 %v2065_v19  ;;  %1495 = vmatprep.subr.bf16.mxu0 %v2068_v20  ;;  %2565 = vst [vmem:[#allocation18_spill] sm:$0xff] %v2165_v29  ;;  %2566 = vst [vmem:[#allocation19_spill] sm:$0xff] %v2168_v30  ;;  %v2171_v38 = vld [vmem:[#allocation2 + $0x1e8] sm:$0xff]   ;;  %v2180_v43 = vld [vmem:[#allocation2 + $0x170] sm:$0xff]  }
  0x27   :  { %1517 = vmatprep.subr.bf16.mxu1 %v2071_v21  ;;  %2567 = vst [vmem:[#allocation20_spill] sm:$0xff] %v2171_v38  ;;  %v2174_v39 = vld [vmem:[#allocation2 + $0x128] sm:$0xff]   ;;  %2570 = vst [vmem:[#allocation23_spill] sm:$0xff] %v2180_v43  ;;  %v2183_v44 = vld [vmem:[#allocation2 + $0x1f0] sm:$0xff]  }
  0x28   :  { %2568 = vst [vmem:[#allocation21_spill] sm:$0xff] %v2174_v39  ;;  %v2177_v40 = vld [vmem:[#allocation2 + $0x1a8] sm:$0xff]   ;;  %2571 = vst [vmem:[#allocation24_spill] sm:$0xff] %v2183_v44  ;;  %v2189_v47 = vld [vmem:[#allocation2 + $0x1b0] sm:$0xff]  }
  0x29   :  { %1496 = vmatpush3.bf16.msra.mxu0 %v2074_v25  ;;  %2569 = vst [vmem:[#allocation22_spill] sm:$0xff] %v2177_v40  ;;  %v2192_v48 = vld [vmem:[#allocation2 + $0x178] sm:$0xff]  }
  0x2a   :  { %1518 = vmatpush3.bf16.msra.mxu1 %v2077_v26  ;;  %1497 = vmatprep.subr.bf16.mxu0 %v2080_v27  ;;  %2573 = vst [vmem:[#allocation26_spill] sm:$0xff] %v2192_v48  ;;  %v2198_v52 = vld [vmem:[#allocation2 + $0x138] sm:$0xff]  }
  0x2b   :  { %1519 = vmatprep.subr.bf16.mxu1 %v2083_v28  ;;  %2574 = vst [vmem:[#allocation27_spill] sm:$0xff] %v2198_v52 }
  0x2d   :  { %1498 = vmatpush3.bf16.msra.mxu0 %v2086_v31 }
  0x2e   :  { %1520 = vmatpush3.bf16.msra.mxu1 %v2089_v32  ;;  %1499 = vmatprep.subr.bf16.mxu0 %v2092_v33 }
  0x2f   :  { %1521 = vmatprep.subr.bf16.mxu1 %v2095_v34 }
  0x31   :  { %1500 = vmatpush3.bf16.msra.mxu0 %v2100_v36 }
  0x32   :  { %1522 = vmatpush3.bf16.msra.mxu1 %v2103_v37  ;;  %1529 = vmatprep.subr.bf16.mxu0 %v2111_v41 }
  0x33   :  { %1551 = vmatprep.subr.bf16.mxu1 %v2113_v42 }
  0x34   :  { %664 = vmatmul.mubr.bf16.vlgmr.msra.gmra.mrb[0].mxu0 %v233_v45  ;;  %v2186_v45 = vld [vmem:[#allocation2 + $0x130] sm:$0xff]  }
  0x35   :  { %1530 = vmatpush3.bf16.msra.mxu0 %v2118_v46  ;;  %704 = vmatmul.mubr.bf16.vlgmr.msra.gmra.mrb[0].mxu1 %v235_v50  ;;  %2572 = vst [vmem:[#allocation25_spill] sm:$0xff] %v2186_v45  ;;  %v2195_v50 = vld [vmem:[#allocation2 + $0x1f8] sm:$0xff]  }
  0x36   :  { %1531 = vmatprep.subr.bf16.mxu0 %v2122_v51  ;;  %1552 = vmatpush3.bf16.msra.mxu1 %v2120_v49 }
  0x37   :  { %1553 = vmatprep.subr.bf16.mxu1 %v2124_v53 }
  0x39   :  { %1532 = vmatpush3.bf16.msra.mxu0 %v2126_v54 }
  0x3a   :  { %1533 = vmatprep.subr.bf16.mxu0 %v2132_v56  ;;  %1554 = vmatpush3.bf16.msra.mxu1 %v2129_v55 }
  0x3b   :  { %1555 = vmatprep.subr.bf16.mxu1 %v2135_v57 }
  0x3d   :  { %1534 = vmatpush3.bf16.msra.mxu0 %v2138_v58 }
  0x3e   :  { %1535 = vmatprep.subr.bf16.mxu0 %v2144_v60  ;;  %1556 = vmatpush3.bf16.msra.mxu1 %v2141_v59 }
  0x3f   :  { %1557 = vmatprep.subr.bf16.mxu1 %v2147_v61 }
  0x41   :  { %1536 = vmatpush3.bf16.msra.mxu0 %v2150_v62 }
  0x42   :  { %1537 = vmatprep.subr.bf16.mxu0 %v2156_v22  ;;  %1558 = vmatpush3.bf16.msra.mxu1 %v2153_v63 }
  0x43   :  { %1559 = vmatprep.subr.bf16.mxu1 %v2159_v23 }
  0x45   :  { %1538 = vmatpush3.bf16.msra.mxu0 %v2162_v24 }
  0x46   :  { %1539 = vmatprep.subr.bf16.mxu0 %v2168_v30  ;;  %1560 = vmatpush3.bf16.msra.mxu1 %v2165_v29  ;;  %v2204_v29 = vld [vmem:[#allocation2 + $0x1b8] sm:$0xff]  }
  0x47   :  { %1561 = vmatprep.subr.bf16.mxu1 %v2171_v38  ;;  %v188_v38 = vld [vmem:[%s2499_s0 + $0x8] sm:$0xff] }
  0x48   :  { %v215_v23 = vrot.slane %v188_v38, %v2097_v35  ;;  %v208_v63 = vcombine.high %v188_v38, %v188_v38  ;;  %v2276_v38 = vld [vmem:[%s2504_s5 + $0x30] sm:$0xff]  }
  0x49   :  { %1540 = vmatpush3.bf16.msra.mxu0 %v2174_v39  ;;  %2581 = vst [vmem:[#allocation34_spill] sm:$0xff] %v2276_v38 }
  0x4a   :  { %1541 = vmatprep.subr.bf16.mxu0 %v2180_v43  ;;  %1562 = vmatpush3.bf16.msra.mxu1 %v2177_v40  ;;  %v223_v40 = vcombine.high %v215_v23, %v215_v23  ;;  %v237_v61 = vpack.c.bf16 %v215_v23, %v215_v23  ;;  %v2269_v23 = vld [vmem:[%s2504_s5 + $0x28] sm:$0xff]  }
  0x4b   :  { %1563 = vmatprep.subr.bf16.mxu1 %v2183_v44  ;;  %v222_v44 = vrot.slane %v208_v63, %v2097_v35  ;;  %v2261_v63 = vld [vmem:[%s2504_s5 + $0x20] sm:$0xff]   ;;  %2580 = vst [vmem:[#allocation33_spill] sm:$0xff] %v2269_v23 }
  0x4c   :  { %v238_v59 = vpack.c.bf16 %v223_v40, %v223_v40  ;;  %2579 = vst [vmem:[#allocation32_spill] sm:$0xff] %v2261_v63  ;;  %v2283_v40 = vld [vmem:[%s2504_s5 + $0x38] sm:$0xff]  }
  0x4d   :  { %1542 = vmatpush3.bf16.msra.mxu0 %v2186_v45  ;;  %v224_v57 = vcombine.high %v222_v44, %v222_v44  ;;  %v239_v55 = vpack.c.bf16 %v222_v44, %v222_v44  ;;  %2582 = vst [vmem:[#allocation35_spill] sm:$0xff] %v2283_v40  ;;  %v2288_v44 = vld [vmem:[%s2500_s1] sm:$0xff] }
  0x4e   :  { %1543 = vmatprep.subr.bf16.mxu0 %v2192_v48  ;;  %1564 = vmatpush3.bf16.msra.mxu1 %v2189_v47 }
  0x4f   :  { %1565 = vmatprep.subr.bf16.mxu1 %v2195_v50  ;;  %743 = vmatprep.mubr.bf16.mxu0 %v238_v59  ;;  %v240_v53 = vpack.c.bf16 %v224_v57, %v224_v57  ;;  %v2240_v57 = vld [vmem:[%s2504_s5 + $0x8] sm:$0xff]   ;;  %v2247_v59 = vld [vmem:[%s2504_s5 + $0x10] sm:$0xff]  }
  0x50   :  { %2576 = vst [vmem:[#allocation29_spill] sm:$0xff] %v2240_v57  ;;  %2577 = vst [vmem:[#allocation30_spill] sm:$0xff] %v2247_v59 }
  0x51   :  { %1544 = vmatpush3.bf16.msra.mxu0 %v2198_v52  ;;  %783 = vmatprep.mubr.bf16.mxu1 %v240_v53  ;;  %v2233_v53 = vld [vmem:[%s2504_s5] sm:$0xff]  }
  0x52   :  { %1566 = vmatpush3.bf16.msra.mxu1 %v2204_v29  ;;  %2575 = vst [vmem:[#allocation28_spill] sm:$0xff] %v2233_v53 }
  0x53   :  { %1582 = vmatprep.subr.bf16.mxu1 %v2009_v0 }
  0x54   :  { %744 = vmatmul.mubr.bf16.vlgmr.msra.gmra.mrb[4].mxu0 %v237_v61  ;;  %v2254_v61 = vld [vmem:[%s2504_s5 + $0x18] sm:$0xff]  }
  0x55   :  { %784 = vmatmul.mubr.bf16.vlgmr.msra.gmra.mrb[4].mxu1 %v239_v55  ;;  %v2533_v55 = vmov 0.0   ;;  %2578 = vst [vmem:[#allocation31_spill] sm:$0xff] %v2254_v61 }
  0x56   :  { %1583 = vmatpush3.bf16.msra.mxu1 %v2014_v2  ;;  %1776 = vmatprep.subr.bf16.mxu0 %v2533_v55 }
  0x57   :  { %1584 = vmatprep.subr.bf16.mxu1 %v2020_v4  ;;  %1777 = vmatpush3.bf16.msra.mxu0 %v2233_v53 }
  0x58   :  { %1778 = vmatprep.subr.bf16.mxu0 %v2533_v55  ;;  %1792 = vmatprep.mubr.msk.bf16.mxu0 %vm1956_vm0, %v2533_v55 }
  0x5a   :  { %1585 = vmatpush3.bf16.msra.mxu1 %v2026_v6 }
  0x5b   :  { %1586 = vmatprep.subr.bf16.mxu1 %v2032_v8  ;;  %1779 = vmatpush3.bf16.msra.mxu0 %v2240_v57 }
  0x5c   :  { %1780 = vmatprep.subr.bf16.mxu0 %v2533_v55 }
  0x5e   :  { %1587 = vmatpush3.bf16.msra.mxu1 %v2038_v10 }
  0x5f   :  { %1588 = vmatprep.subr.bf16.mxu1 %v2044_v12  ;;  %1781 = vmatpush3.bf16.msra.mxu0 %v2247_v59 }
  0x60   :  { %1782 = vmatprep.subr.bf16.mxu0 %v2533_v55 }
  0x62   :  { %1589 = vmatpush3.bf16.msra.mxu1 %v2050_v14 }
  0x63   :  { %1590 = vmatprep.subr.bf16.mxu1 %v2056_v16  ;;  %1783 = vmatpush3.bf16.msra.mxu0 %v2254_v61 }
  0x64   :  { %1784 = vmatprep.subr.bf16.mxu0 %v2533_v55 }
  0x66   :  { %1591 = vmatpush3.bf16.msra.mxu1 %v2062_v18 }
  0x67   :  { %1592 = vmatprep.subr.bf16.mxu1 %v2068_v20  ;;  %1785 = vmatpush3.bf16.msra.mxu0 %v2261_v63 }
  0x68   :  { %1786 = vmatprep.subr.bf16.mxu0 %v2533_v55 }
  0x6a   :  { %1593 = vmatpush3.bf16.msra.mxu1 %v2074_v25 }
  0x6b   :  { %1594 = vmatprep.subr.bf16.mxu1 %v2080_v27  ;;  %1787 = vmatpush3.bf16.msra.mxu0 %v2269_v23 }
  0x6c   :  { %1788 = vmatprep.subr.bf16.mxu0 %v2533_v55 }
  0x6e   :  { %1595 = vmatpush3.bf16.msra.mxu1 %v2086_v31 }
  0x6f   :  { %1596 = vmatprep.subr.bf16.mxu1 %v2092_v33  ;;  %1789 = vmatpush3.bf16.msra.mxu0 %v2276_v38 }
  0x70   :  { %1790 = vmatprep.subr.bf16.mxu0 %v2533_v55 }
  0x72   :  { %1597 = vmatpush3.bf16.msra.mxu1 %v2100_v36 }
  0x73   :  { %1626 = vmatprep.subr.bf16.mxu1 %v2111_v41  ;;  %v899_v41 = vrot.slane %v2288_v44, %v2097_v35  ;;  %1791 = vmatpush3.bf16.msra.mxu0 %v2283_v40 }
  0x74   :  { %1604 = vmatprep.subr.bf16.mxu0 %v2011_v1 }
  0x75   :  { %v907_v36 = vcombine.high %v899_v41, %v899_v41  ;;  %v934_v31 = vpack.c.bf16 %v899_v41, %v899_v41 }
  0x77   :  { %v935_v33 = vpack.c.bf16 %v907_v36, %v907_v36 }
  0x79   :  { %974 = vmatprep.mubr.bf16.mxu1 %v935_v33 }
  0x7a   :  { %975 = vmatmul.mubr.bf16.vlgmr.msra.gmra.mrb[8].mxu1 %v934_v31  ;;  %v2311_v31 = vld [vmem:[%s2500_s1 + $0x8] sm:$0xff] }
  0x7b   :  { %1627 = vmatpush3.bf16.msra.mxu1 %v2118_v46  ;;  %v916_v33 = vrot.slane %v2311_v31, %v2097_v35 }
  0x7c   :  { %1628 = vmatprep.subr.bf16.mxu1 %v2122_v51 }
  0x7d   :  { %v924_v36 = vcombine.high %v916_v33, %v916_v33  ;;  %v938_v55 = vpack.c.bf16 %v916_v33, %v916_v33  ;;  %v2340_v33 = vld [vmem:[%s2503_s4] ss:$0 sm:$0xff] }
  0x7f   :  { %1629 = vmatpush3.bf16.msra.mxu1 %v2126_v54  ;;  %v939_v41 = vpack.c.bf16 %v924_v36, %v924_v36 }
  0x80   :  { %1630 = vmatprep.subr.bf16.mxu1 %v2132_v56 }
  0x81   :  { %1054 = vmatprep.mubr.bf16.mxu1 %v939_v41 }
  0x83   :  { %1631 = vmatpush3.bf16.msra.mxu1 %v2138_v58 }
  0x84   :  { %1632 = vmatprep.subr.bf16.mxu1 %v2144_v60 }
  0x87   :  { %1633 = vmatpush3.bf16.msra.mxu1 %v2150_v62 }
  0x88   :  { %1634 = vmatprep.subr.bf16.mxu1 %v2156_v22 }
  0x8b   :  { %1635 = vmatpush3.bf16.msra.mxu1 %v2162_v24 }
  0x8c   :  { %1636 = vmatprep.subr.bf16.mxu1 %v2168_v30 }
  0x8f   :  { %1637 = vmatpush3.bf16.msra.mxu1 %v2174_v39  ;;  %v2583_v39 = vmov 0.0  }
  0x90   :  { %1638 = vmatprep.subr.bf16.mxu1 %v2180_v43 }
  0x93   :  { %1639 = vmatpush3.bf16.msra.mxu1 %v2186_v45 }
  0x94   :  { %1640 = vmatprep.subr.bf16.mxu1 %v2192_v48 }
  0x97   :  { %1641 = vmatpush3.bf16.msra.mxu1 %v2198_v52 }
  0x98   :  { %1796 = vmatprep.subr.bf16.mxu1 %v2583_v39 }
  0x9a   :  { %1055 = vmatmul.mubr.bf16.vlgmr.msra.gmra.mrb[12].mxu1 %v938_v55 }
  0x9b   :  { %1797 = vmatpush3.bf16.msra.mxu1 %v2233_v53  ;;  %1812 = vmatprep.mubr.msk.bf16.mxu1 %vm1956_vm0, %v2583_v39 }
  0x9c   :  { %1798 = vmatprep.subr.bf16.mxu1 %v2583_v39 }
  0x9f   :  { %1799 = vmatpush3.bf16.msra.mxu1 %v2240_v57 }
  0xa0   :  { %1800 = vmatprep.subr.bf16.mxu1 %v2583_v39 }
  0xa3   :  { %1801 = vmatpush3.bf16.msra.mxu1 %v2247_v59 }
  0xa4   :  { %1802 = vmatprep.subr.bf16.mxu1 %v2583_v39 }
  0xa7   :  { %1803 = vmatpush3.bf16.msra.mxu1 %v2254_v61 }
  0xa8   :  { %1804 = vmatprep.subr.bf16.mxu1 %v2583_v39 }
  0xab   :  { %1805 = vmatpush3.bf16.msra.mxu1 %v2261_v63 }
  0xac   :  { %1806 = vmatprep.subr.bf16.mxu1 %v2583_v39 }
  0xaf   :  { %1807 = vmatpush3.bf16.msra.mxu1 %v2269_v23 }
  0xb0   :  { %1808 = vmatprep.subr.bf16.mxu1 %v2583_v39 }
  0xb3   :  { %1809 = vmatpush3.bf16.msra.mxu1 %v2276_v38 }
  0xb4   :  { %1810 = vmatprep.subr.bf16.mxu1 %v2583_v39 }
  0xb7   :  { %1811 = vmatpush3.bf16.msra.mxu1 %v2283_v40 }
  0xb8   :  { %1701 = vmatprep.subr.bf16.mxu1 %v2011_v1  ;;  %v892_v1 = vcombine.high %v2288_v44, %v2288_v44  ;;  %v2594_v44 = vld [vmem:[#allocation24_spill] sm:$0xff] }
  0xba   :  { %v906_v45 = vrot.slane %v892_v1, %v2097_v35  ;;  %v2404_v1 = vld [vmem:[%s2501_s2] sm:$0xff] }
 0x107   :  { %v1501_v55 = vpop.f32.mrb[0].mxu0 }
 0x108   :  { %v1502_v36 = vpop.f32.mrb[1].mxu0  ;;  %v1523_v41 = vpop.f32.mrb[0].mxu1 }
 0x109   :  { %v1503_v63 = vadd.f32 %v1502_v36, %v1501_v55  ;;  %v1504_v23 = vpop.f32.mrb[2].mxu0  ;;  %v1524_v61 = vpop.f32.mrb[1].mxu1 }
 0x10a   :  { %v1505_v59 = vpop.f32.mrb[3].mxu0  ;;  %v1525_v57 = vadd.f32 %v1524_v61, %v1523_v41  ;;  %v1526_v53 = vpop.f32.mrb[2].mxu1  ;;  %v908_v61 = vcombine.high %v906_v45, %v906_v45 }
 0x10b   :  { %v666_v38 = vadd.f32 %v1503_v63, %v2340_v33  ;;  %v1527_v39 = vpop.f32.mrb[3].mxu1 }
 0x10d   :  { %v706_v40 = vadd.f32 %v1525_v57, %v666_v38  ;;  %v937_v57 = vpack.c.bf16 %v908_v61, %v908_v61  ;;  %v2600_v61 = vld [vmem:[#allocation17_spill] sm:$0xff] }
 0x127   :  { %v1545_v52 = vpop.f32.mrb[4].mxu0 }
 0x128   :  { %v1546_v48 = vpop.f32.mrb[5].mxu0  ;;  %v1567_v43 = vpop.f32.mrb[4].mxu1 }
 0x129   :  { %v1547_v30 = vadd.f32 %v1546_v48, %v1545_v52  ;;  %v1548_v24 = vpop.f32.mrb[6].mxu0  ;;  %v1568_v55 = vpop.f32.mrb[5].mxu1  ;;  %v2591_v48 = vld [vmem:[#allocation18_spill] sm:$0xff]  ;;  %v2592_v52 = vld [vmem:[#allocation20_spill] sm:$0xff] }
 0x12a   :  { %v1549_v23 = vpop.f32.mrb[7].mxu0  ;;  %v1569_v59 = vadd.f32 %v1568_v55, %v1567_v43  ;;  %v1570_v22 = vpop.f32.mrb[6].mxu1  ;;  %v2587_v24 = vld [vmem:[#allocation12_spill] sm:$0xff]  ;;  %v2589_v43 = vld [vmem:[#allocation14_spill] sm:$0xff]  ;;  %v1157_v55 = vrot.slane %v2404_v1, %v2097_v35 }
 0x12b   :  { %v746_v36 = vadd.f32 %v1547_v30, %v706_v40  ;;  %v1571_v63 = vpop.f32.mrb[7].mxu1  ;;  %v2586_v22 = vld [vmem:[#allocation11_spill] sm:$0xff]  ;;  %v2588_v30 = vld [vmem:[#allocation13_spill] sm:$0xff]  ;;  %v2593_v40 = vld [vmem:[#allocation22_spill] sm:$0xff] }
 0x12c   :  { %v1165_v23 = vcombine.high %v1157_v55, %v1157_v55  ;;  %v2599_v63 = vld [vmem:[#allocation15_spill] sm:$0xff] }
 0x12d   :  { %v786_v53 = vadd.f32 %v1569_v59, %v746_v36  ;;  %v1192_v59 = vpack.c.bf16 %v1157_v55, %v1157_v55 }
 0x12e   :  { %v1193_v36 = vpack.c.bf16 %v1165_v23, %v1165_v23 }
 0x12f   :  { %v791_v39 = vmax.f32 %v786_v53, 0.0  ;;  %v2601_v53 = vld [vmem:[#allocation19_spill] sm:$0xff] }
 0x131   :  { %v792_v38 = vpack.c.bf16 %v791_v39, %v791_v39  ;;  %v2602_v39 = vld [vmem:[#allocation21_spill] sm:$0xff] }
 0x133   :  { %1793 = vmatmul.mubr.bf16.vlgmr.msra.gmra.mrb[8].mxu0 %v792_v38 }
 0x134   :  { %1605 = vmatpush3.bf16.msra.mxu0 %v2017_v3  ;;  %1014 = vmatprep.mubr.bf16.mxu0 %v937_v57  ;;  %v909_v3 = vcombine.high %v2311_v31, %v2311_v31  ;;  %v2606_v57 = vld [vmem:[#allocation27_spill] sm:$0xff] }
 0x135   :  { %1606 = vmatprep.subr.bf16.mxu0 %v2023_v5 }
 0x136   :  { %v923_v5 = vrot.slane %v909_v3, %v2097_v35  ;;  %v2607_v3 = vmov 0.0  }
 0x138   :  { %1607 = vmatpush3.bf16.msra.mxu0 %v2029_v7  ;;  %v925_v7 = vcombine.high %v923_v5, %v923_v5  ;;  %v940_v31 = vpack.c.bf16 %v923_v5, %v923_v5  ;;  %v2608_v5 = vld [vmem:[#allocation28_spill] sm:$0xff] }
 0x139   :  { %1608 = vmatprep.subr.bf16.mxu0 %v2035_v9  ;;  %v936_v9 = vpack.c.bf16 %v906_v45, %v906_v45  ;;  %v2590_v45 = vld [vmem:[#allocation16_spill] sm:$0xff] }
 0x13c   :  { %1609 = vmatpush3.bf16.msra.mxu0 %v2041_v11  ;;  %v941_v11 = vpack.c.bf16 %v925_v7, %v925_v7  ;;  %v2609_v7 = vld [vmem:[#allocation29_spill] sm:$0xff] }
 0x13d   :  { %1610 = vmatprep.subr.bf16.mxu0 %v2047_v13  ;;  %v2584_v13 = vld [vmem:[#allocation9_spill] sm:$0xff] }
 0x140   :  { %1611 = vmatpush3.bf16.msra.mxu0 %v2053_v15  ;;  %v2585_v15 = vld [vmem:[#allocation10_spill] sm:$0xff] }
 0x141   :  { %1612 = vmatprep.subr.bf16.mxu0 %v2059_v17 }
 0x144   :  { %1613 = vmatpush3.bf16.msra.mxu0 %v2065_v19 }
 0x145   :  { %1614 = vmatprep.subr.bf16.mxu0 %v2071_v21 }
 0x148   :  { %1615 = vmatpush3.bf16.msra.mxu0 %v2077_v26 }
 0x149   :  { %1616 = vmatprep.subr.bf16.mxu0 %v2083_v28 }
 0x14c   :  { %1617 = vmatpush3.bf16.msra.mxu0 %v2089_v32 }
 0x14d   :  { %1618 = vmatprep.subr.bf16.mxu0 %v2095_v34 }
 0x150   :  { %1619 = vmatpush3.bf16.msra.mxu0 %v2103_v37 }
 0x151   :  { %1648 = vmatprep.subr.bf16.mxu0 %v2113_v42 }
 0x153   :  { %1015 = vmatmul.mubr.bf16.vlgmr.msra.gmra.mrb[12].mxu0 %v936_v9  ;;  %v2610_v9 = vld [vmem:[#allocation30_spill] sm:$0xff] }
 0x154   :  { %1649 = vmatpush3.bf16.msra.mxu0 %v2120_v49  ;;  %1094 = vmatprep.mubr.bf16.mxu0 %v941_v11  ;;  %v2611_v11 = vld [vmem:[#allocation31_spill] sm:$0xff] }
 0x155   :  { %1650 = vmatprep.subr.bf16.mxu0 %v2584_v13 }
 0x158   :  { %1651 = vmatpush3.bf16.msra.mxu0 %v2585_v15 }
 0x159   :  { %1652 = vmatprep.subr.bf16.mxu0 %v2586_v22 }
 0x15c   :  { %1653 = vmatpush3.bf16.msra.mxu0 %v2587_v24 }
 0x15d   :  { %1654 = vmatprep.subr.bf16.mxu0 %v2588_v30 }
 0x160   :  { %1655 = vmatpush3.bf16.msra.mxu0 %v2589_v43 }
 0x161   :  { %1656 = vmatprep.subr.bf16.mxu0 %v2590_v45 }
 0x164   :  { %1657 = vmatpush3.bf16.msra.mxu0 %v2591_v48 }
 0x165   :  { %1658 = vmatprep.subr.bf16.mxu0 %v2592_v52 }
 0x168   :  { %1659 = vmatpush3.bf16.msra.mxu0 %v2593_v40 }
 0x169   :  { %1660 = vmatprep.subr.bf16.mxu0 %v2594_v44 }
 0x16c   :  { %1661 = vmatpush3.bf16.msra.mxu0 %v2189_v47 }
 0x16d   :  { %1662 = vmatprep.subr.bf16.mxu0 %v2195_v50 }
 0x170   :  { %1663 = vmatpush3.bf16.msra.mxu0 %v2204_v29 }
 0x171   :  { %1679 = vmatprep.subr.bf16.mxu0 %v2009_v0  ;;  %v1598_v0 = vpop.f32.mrb[8].mxu1 }
 0x173   :  { %1095 = vmatmul.mubr.bf16.vlgmr.msra.gmra.mrb[16].mxu0 %v940_v31  ;;  %v2444_v31 = vld [vmem:[%s2505_s6] ss:$0 sm:$0xff] }
 0x174   :  { %1680 = vmatpush3.bf16.msra.mxu0 %v2014_v2  ;;  %v1599_v2 = vpop.f32.mrb[9].mxu1  ;;  %1232 = vmatprep.mubr.bf16.mxu0 %v1193_v36 }
 0x175   :  { %1681 = vmatprep.subr.bf16.mxu0 %v2020_v4  ;;  %v2393_v4 = vadd.f32 %v1599_v2, %v1598_v0  ;;  %v2612_v0 = vld [vmem:[#allocation32_spill] sm:$0xff] }
 0x178   :  { %1682 = vmatpush3.bf16.msra.mxu0 %v2026_v6  ;;  %v1601_v6 = vpop.f32.mrb[10].mxu1 }
 0x179   :  { %1683 = vmatprep.subr.bf16.mxu0 %v2032_v8  ;;  %v2595_v8 = vld [vmem:[#allocation5_spill] sm:$0xff] }
 0x17c   :  { %1684 = vmatpush3.bf16.msra.mxu0 %v2038_v10  ;;  %v1602_v10 = vpop.f32.mrb[11].mxu1 }
 0x17d   :  { %1685 = vmatprep.subr.bf16.mxu0 %v2044_v12  ;;  %v2596_v12 = vld [vmem:[#allocation6_spill] sm:$0xff] }
 0x180   :  { %1686 = vmatpush3.bf16.msra.mxu0 %v2050_v14  ;;  %v2597_v14 = vld [vmem:[#allocation7_spill] sm:$0xff] }
 0x181   :  { %1687 = vmatprep.subr.bf16.mxu0 %v2056_v16  ;;  %v2598_v16 = vld [vmem:[#allocation8_spill] sm:$0xff] }
 0x184   :  { %1688 = vmatpush3.bf16.msra.mxu0 %v2062_v18  ;;  %v1642_v18 = vpop.f32.mrb[12].mxu1 }
 0x185   :  { %1689 = vmatprep.subr.bf16.mxu0 %v2068_v20  ;;  %v1643_v20 = vpop.f32.mrb[13].mxu1 }
 0x186   :  { %v2399_v41 = vadd.f32 %v1643_v20, %v1642_v18  ;;  %v2615_v18 = vld [vmem:[#allocation35_spill] sm:$0xff]  ;;  %v977_v20 = vadd.f32 %v2393_v4, %v2340_v33 }
 0x188   :  { %1690 = vmatpush3.bf16.msra.mxu0 %v2074_v25  ;;  %v1645_v25 = vpop.f32.mrb[14].mxu1 }
 0x189   :  { %1691 = vmatprep.subr.bf16.mxu0 %v2080_v27  ;;  %v1646_v27 = vpop.f32.mrb[15].mxu1 }
 0x18c   :  { %1692 = vmatpush3.bf16.msra.mxu0 %v2595_v8 }
 0x18d   :  { %1693 = vmatprep.subr.bf16.mxu0 %v2596_v12  ;;  %v2613_v12 = vld [vmem:[#allocation33_spill] sm:$0xff] }
 0x190   :  { %1694 = vmatpush3.bf16.msra.mxu0 %v2597_v14 }
 0x191   :  { %1723 = vmatprep.subr.bf16.mxu0 %v2598_v16  ;;  %v2614_v16 = vld [vmem:[#allocation34_spill] sm:$0xff] }
 0x193   :  { %1233 = vmatmul.mubr.bf16.vlgmr.msra.gmra.mrb[20].mxu0 %v1192_v59 }
 0x194   :  { %1724 = vmatpush3.bf16.msra.mxu0 %v2118_v46  ;;  %v2603_v46 = vld [vmem:[#allocation23_spill] sm:$0xff] }
 0x195   :  { %1725 = vmatprep.subr.bf16.mxu0 %v2122_v51  ;;  %v2423_v51 = vld [vmem:[%s2501_s2 + $0x8] sm:$0xff] }
 0x198   :  { %1726 = vmatpush3.bf16.msra.mxu0 %v2126_v54  ;;  %v1174_v54 = vrot.slane %v2423_v51, %v2097_v35 }
 0x199   :  { %1727 = vmatprep.subr.bf16.mxu0 %v2132_v56  ;;  %v2604_v56 = vld [vmem:[#allocation25_spill] sm:$0xff] }
 0x19a   :  { %v1196_v38 = vpack.c.bf16 %v1174_v54, %v1174_v54 }
 0x19c   :  { %1728 = vmatpush3.bf16.msra.mxu0 %v2138_v58  ;;  %v2605_v58 = vld [vmem:[#allocation26_spill] sm:$0xff] }
 0x19d   :  { %1729 = vmatprep.subr.bf16.mxu0 %v2144_v60  ;;  %v1182_v60 = vcombine.high %v1174_v54, %v1174_v54 }
 0x1a0   :  { %1730 = vmatpush3.bf16.msra.mxu0 %v2150_v62  ;;  %v1197_v62 = vpack.c.bf16 %v1182_v60, %v1182_v60 }
 0x1a1   :  { %1731 = vmatprep.subr.bf16.mxu0 %v2599_v63 }
 0x1a2   :  { %1312 = vmatprep.mubr.bf16.mxu0 %v1197_v62 }
 0x1a4   :  { %1732 = vmatpush3.bf16.msra.mxu0 %v2600_v61  ;;  %v1150_v61 = vcombine.high %v2404_v1, %v2404_v1  ;;  %v1923_v1 = vld [vmem:[#allocation2 + $0xd0] sm:$0xff]  }
 0x1a5   :  { %1733 = vmatprep.subr.bf16.mxu0 %v2601_v53 }
 0x1a6   :  { %v1164_v53 = vrot.slane %v1150_v61, %v2097_v35 }
 0x1a8   :  { %1734 = vmatpush3.bf16.msra.mxu0 %v2602_v39  ;;  %v1166_v60 = vcombine.high %v1164_v53, %v1164_v53 }
 0x1a9   :  { %1735 = vmatprep.subr.bf16.mxu0 %v2603_v46 }
 0x1ac   :  { %1736 = vmatpush3.bf16.msra.mxu0 %v2604_v56 }
 0x1ad   :  { %1737 = vmatprep.subr.bf16.mxu0 %v2605_v58 }
 0x1b0   :  { %1738 = vmatpush3.bf16.msra.mxu0 %v2606_v57  ;;  %v1195_v57 = vpack.c.bf16 %v1166_v60, %v1166_v60 }
 0x1b1   :  { %1816 = vmatprep.subr.bf16.mxu0 %v2607_v3 }
 0x1b3   :  { %1313 = vmatmul.mubr.bf16.vlgmr.msra.gmra.mrb[24].mxu0 %v1196_v38 }
 0x1b4   :  { %1817 = vmatpush3.bf16.msra.mxu0 %v2608_v5  ;;  %1832 = vmatprep.mubr.msk.bf16.mxu0 %vm1956_vm0, %v2607_v3  ;;  %v1922_v5 = vld [vmem:[#allocation2 + $0x88] sm:$0xff]  }
 0x1b5   :  { %1818 = vmatprep.subr.bf16.mxu0 %v2607_v3 }
 0x1b8   :  { %1819 = vmatpush3.bf16.msra.mxu0 %v2609_v7  ;;  %v1924_v7 = vld [vmem:[#allocation2 + $0x90] sm:$0xff]  }
 0x1b9   :  { %1820 = vmatprep.subr.bf16.mxu0 %v2607_v3 }
 0x1bc   :  { %1821 = vmatpush3.bf16.msra.mxu0 %v2610_v9  ;;  %v1925_v9 = vld [vmem:[#allocation2 + $0xd8] sm:$0xff]  }
 0x1bd   :  { %1822 = vmatprep.subr.bf16.mxu0 %v2607_v3 }
 0x1c0   :  { %1823 = vmatpush3.bf16.msra.mxu0 %v2611_v11  ;;  %v1926_v11 = vld [vmem:[#allocation2 + $0x98] sm:$0xff]  }
 0x1c1   :  { %1824 = vmatprep.subr.bf16.mxu0 %v2607_v3 }
 0x1c4   :  { %1825 = vmatpush3.bf16.msra.mxu0 %v2612_v0  ;;  %v1167_v0 = vcombine.high %v2423_v51, %v2423_v51 }
 0x1c5   :  { %1826 = vmatprep.subr.bf16.mxu0 %v2607_v3 }
 0x1c8   :  { %1827 = vmatpush3.bf16.msra.mxu0 %v2613_v12 }
 0x1c9   :  { %1828 = vmatprep.subr.bf16.mxu0 %v2607_v3 }
 0x1cc   :  { %1829 = vmatpush3.bf16.msra.mxu0 %v2614_v16 }
 0x1cd   :  { %1830 = vmatprep.subr.bf16.mxu0 %v2607_v3  ;;  %v1920_v3 = vld [vmem:[#allocation2 + $0x80] sm:$0xff]  }
 0x1d0   :  { %1831 = vmatpush3.bf16.msra.mxu0 %v2615_v18 }
 0x206   :  { %v881_v2 = vpop.f32.mrb[8].mxu0 }
 0x207   :  { %v882_v6 = vadd.f32 %v2444_v31, %v881_v2  ;;  %v1794_v8 = vpop.f32.mrb[9].mxu0  ;;  %v1181_v2 = vrot.slane %v1167_v0, %v2097_v35 }
 0x208   :  { %v884_v10 = vpop.f32.mrb[10].mxu0  ;;  %v1194_v8 = vpack.c.bf16 %v1164_v53, %v1164_v53 }
 0x209   :  { %887 = vst [vmem:[%s2506_s7] sm:$0x3] %v882_v6  ;;  %v1795_v14 = vpop.f32.mrb[11].mxu0  ;;  %v1183_v6 = vcombine.high %v1181_v2, %v1181_v2 }
 0x226   :  { %v1620_v25 = vpop.f32.mrb[12].mxu0 }
 0x227   :  { %v1621_v27 = vpop.f32.mrb[13].mxu0 }
 0x228   :  { %v1622_v55 = vadd.f32 %v1621_v27, %v1620_v25  ;;  %v1623_v23 = vpop.f32.mrb[14].mxu0 }
 0x229   :  { %v1624_v36 = vpop.f32.mrb[15].mxu0 }
 0x22a   :  { %v1017_v59 = vadd.f32 %v1622_v55, %v977_v20 }
 0x22c   :  { %v1057_v63 = vadd.f32 %v2399_v41, %v1017_v59  ;;  %v1921_v41 = vld [vmem:[#allocation2 + $0xc8] sm:$0xff]  }
 0x246   :  { %v1664_v39 = vpop.f32.mrb[16].mxu0 }
 0x247   :  { %v1665_v46 = vpop.f32.mrb[17].mxu0 }
 0x248   :  { %v1666_v54 = vadd.f32 %v1665_v46, %v1664_v39  ;;  %v1667_v56 = vpop.f32.mrb[18].mxu0 }
 0x249   :  { %v1668_v58 = vpop.f32.mrb[19].mxu0 }
 0x24a   :  { %v1097_v4 = vadd.f32 %v1666_v54, %v1057_v63 }
 0x24c   :  { %v1102_v62 = vmax.f32 %v1097_v4, 0.0 }
 0x24e   :  { %v1103_v38 = vpack.c.bf16 %v1102_v62, %v1102_v62 }
 0x250   :  { %1813 = vmatmul.mubr.bf16.vlgmr.msra.gmra.mrb[16].mxu1 %v1103_v38 }
 0x251   :  { %1702 = vmatpush3.bf16.msra.mxu1 %v1920_v3  ;;  %1272 = vmatprep.mubr.bf16.mxu1 %v1195_v57 }
 0x252   :  { %1703 = vmatprep.subr.bf16.mxu1 %v1921_v41 }
 0x255   :  { %1704 = vmatpush3.bf16.msra.mxu1 %v1922_v5 }
 0x256   :  { %1705 = vmatprep.subr.bf16.mxu1 %v1923_v1 }
 0x259   :  { %1706 = vmatpush3.bf16.msra.mxu1 %v1924_v7 }
 0x25a   :  { %1707 = vmatprep.subr.bf16.mxu1 %v1925_v9 }
 0x25d   :  { %1708 = vmatpush3.bf16.msra.mxu1 %v1926_v11 }
 0x25e   :  { %1709 = vmatprep.subr.bf16.mxu1 %v2059_v17  ;;  %v1199_v17 = vpack.c.bf16 %v1183_v6, %v1183_v6 }
 0x261   :  { %1710 = vmatpush3.bf16.msra.mxu1 %v2065_v19  ;;  %v1198_v19 = vpack.c.bf16 %v1181_v2, %v1181_v2 }
 0x262   :  { %1711 = vmatprep.subr.bf16.mxu1 %v2071_v21 }
 0x265   :  { %1712 = vmatpush3.bf16.msra.mxu1 %v2077_v26 }
 0x266   :  { %1713 = vmatprep.subr.bf16.mxu1 %v2083_v28  ;;  %v1695_v21 = vpop.f32.mrb[20].mxu0 }
 0x267   :  { %v1696_v26 = vpop.f32.mrb[21].mxu0 }
 0x268   :  { %v1697_v28 = vadd.f32 %v1696_v26, %v1695_v21 }
 0x269   :  { %1714 = vmatpush3.bf16.msra.mxu1 %v2089_v32  ;;  %v1698_v32 = vpop.f32.mrb[22].mxu0 }
 0x26a   :  { %1715 = vmatprep.subr.bf16.mxu1 %v2095_v34  ;;  %v1699_v34 = vpop.f32.mrb[23].mxu0 }
 0x26d   :  { %1716 = vmatpush3.bf16.msra.mxu1 %v2103_v37 }
 0x26e   :  { %1745 = vmatprep.subr.bf16.mxu1 %v2113_v42 }
 0x270   :  { %1273 = vmatmul.mubr.bf16.vlgmr.msra.gmra.mrb[20].mxu1 %v1194_v8 }
 0x271   :  { %1746 = vmatpush3.bf16.msra.mxu1 %v2120_v49  ;;  %1352 = vmatprep.mubr.bf16.mxu1 %v1199_v17 }
 0x272   :  { %1747 = vmatprep.subr.bf16.mxu1 %v2584_v13 }
 0x275   :  { %1748 = vmatpush3.bf16.msra.mxu1 %v2585_v15 }
 0x276   :  { %1749 = vmatprep.subr.bf16.mxu1 %v2586_v22 }
 0x279   :  { %1750 = vmatpush3.bf16.msra.mxu1 %v2587_v24 }
 0x27a   :  { %1751 = vmatprep.subr.bf16.mxu1 %v2588_v30 }
 0x27d   :  { %1752 = vmatpush3.bf16.msra.mxu1 %v2589_v43 }
 0x27e   :  { %1753 = vmatprep.subr.bf16.mxu1 %v2590_v45 }
 0x281   :  { %1754 = vmatpush3.bf16.msra.mxu1 %v2591_v48 }
 0x282   :  { %1755 = vmatprep.subr.bf16.mxu1 %v2592_v52 }
 0x285   :  { %1756 = vmatpush3.bf16.msra.mxu1 %v2593_v40 }
 0x286   :  { %1757 = vmatprep.subr.bf16.mxu1 %v2594_v44  ;;  %v1739_v35 = vpop.f32.mrb[24].mxu0 }
 0x287   :  { %v1740_v37 = vpop.f32.mrb[25].mxu0 }
 0x288   :  { %v1741_v42 = vadd.f32 %v1740_v37, %v1739_v35  ;;  %v1742_v49 = vpop.f32.mrb[26].mxu0 }
 0x289   :  { %1758 = vmatpush3.bf16.msra.mxu1 %v2189_v47  ;;  %v1743_v13 = vpop.f32.mrb[27].mxu0 }
 0x28a   :  { %1759 = vmatprep.subr.bf16.mxu1 %v2195_v50  ;;  %v1235_v50 = vadd.f32 %v1697_v28, %v2340_v33 }
 0x28d   :  { %1760 = vmatpush3.bf16.msra.mxu1 %v2204_v29 }
 0x290   :  { %1353 = vmatmul.mubr.bf16.vlgmr.msra.gmra.mrb[24].mxu1 %v1198_v19 }
 0x323   :  { %v1138_v15 = vpop.f32.mrb[16].mxu1 }
 0x324   :  { %v1139_v22 = vadd.f32 %v2444_v31, %v1138_v15  ;;  %v1814_v47 = vpop.f32.mrb[17].mxu1 }
 0x325   :  { %v1141_v24 = vpop.f32.mrb[18].mxu1 }
 0x326   :  { %1483 = vst [vmem:[%s2506_s7 + $0x2] sm:$0x3] %v1139_v22  ;;  %v1815_v29 = vpop.f32.mrb[19].mxu1 }
 0x343   :  { %v1717_v30 = vpop.f32.mrb[20].mxu1 }
 0x344   :  { %v1718_v43 = vpop.f32.mrb[21].mxu1 }
 0x345   :  { %v1719_v45 = vadd.f32 %v1718_v43, %v1717_v30  ;;  %v1720_v48 = vpop.f32.mrb[22].mxu1 }
 0x346   :  { %v1721_v52 = vpop.f32.mrb[23].mxu1 }
 0x347   :  { %v1275_v40 = vadd.f32 %v1719_v45, %v1235_v50 }
 0x349   :  { %v1315_v44 = vadd.f32 %v1741_v42, %v1275_v40 }
 0x363   :  { %v1761_v51 = vpop.f32.mrb[24].mxu1 }
 0x364   :  { %v1762_v10 = vpop.f32.mrb[25].mxu1 }
 0x365   :  { %v1763_v12 = vadd.f32 %v1762_v10, %v1761_v51  ;;  %v1764_v14 = vpop.f32.mrb[26].mxu1 }
 0x366   :  { %v1765_v16 = vpop.f32.mrb[27].mxu1 }
 0x367   :  { %v1355_v18 = vadd.f32 %v1763_v12, %v1315_v44 }
 0x369   :  { %v1360_v20 = vmax.f32 %v1355_v18, 0.0 }
 0x36b   :  { %v1361_v25 = vpack.c.bf16 %v1360_v20, %v1360_v20 }
 0x36d   :  { %1833 = vmatmul.mubr.bf16.vlgmr.msra.gmra.mrb[28].mxu0 %v1361_v25 }
 0x440   :  { %v1396_v27 = vpop.f32.mrb[28].mxu0 }
 0x441   :  { %v1397_v55 = vadd.f32 %v2444_v31, %v1396_v27  ;;  %v1834_v33 = vpop.f32.mrb[29].mxu0 }
 0x442   :  { %v1399_v23 = vpop.f32.mrb[30].mxu0 }
 0x443   :  { %1484 = vst [vmem:[%s2506_s7 + $0x4] sm:$0x3] %v1397_v55  ;;  %v1835_v36 = vpop.f32.mrb[31].mxu0 }
 0x444   :  { %1408 = vsyncpa [#allocation3], 1 }

</bundles_post_ra>
